<compile_context>
chip_gen: v6e
topology: v6e:2x2x1
jax: 0.10.0
libtpu: 0.0.40
codegen_flags: <defaults>
</compile_context>

<pallas_src>
import math
from functools import partial, lru_cache

import jax
import jax.numpy as jnp
from jax.experimental import pallas as pl
from jax.experimental.pallas import tpu as pltpu

LANE = 128
COMPUTE_DTYPE = jnp.bfloat16   # MXU operand dtype; accumulation stays f32.


def _round_up(x, m):
    return (x + m - 1) // m * m


def _pad2d(x, rp, cp):
    r, c = x.shape
    if r == rp and c == cp:
        return x
    return jnp.pad(x, ((0, rp - r), (0, cp - c)))


def _pick_tile(dim, candidates):
    for c in candidates:
        if dim % c == 0:
            return c
    return dim


# ---------------------------------------------------------------------------
# Fused matmul (+bias +ReLU) Pallas kernel
# ---------------------------------------------------------------------------

def _mm_kernel(*refs, relu, nk, has_bias):
    if has_bias:
        a_ref, b_ref, bias_ref, o_ref, acc_ref = refs
    else:
        a_ref, b_ref, o_ref, acc_ref = refs
        bias_ref = None

    k = pl.program_id(2)

    @pl.when(k == 0)
    def _():
        acc_ref[...] = jnp.zeros_like(acc_ref)

    acc_ref[...] += jnp.dot(a_ref[...], b_ref[...],
                            preferred_element_type=jnp.float32)

    @pl.when(k == nk - 1)
    def _():
        out = acc_ref[...]
        if bias_ref is not None:
            out = out + bias_ref[...]          # bias fused into the epilogue
        if relu:
            out = jnp.maximum(out, 0.0)        # ReLU fused into the epilogue
        o_ref[...] = out.astype(o_ref.dtype)


@lru_cache(maxsize=None)
def _build_matmul(Mp, Kp, Np, tm, tk, tn, relu, has_bias,
                  in_dtype_name, out_dtype_name):
    in_dtype = jnp.dtype(in_dtype_name)
    out_dtype = jnp.dtype(out_dtype_name)
    nk = Kp // tk

    in_specs = [
        pl.BlockSpec((tm, tk), lambda i, j, k: (i, k)),
        pl.BlockSpec((tk, tn), lambda i, j, k: (k, j)),
    ]
    if has_bias:
        # Block index (0, j) is constant over the inner k axis -> the bias
        # tile is not re-DMA'd on every k step.
        in_specs.append(pl.BlockSpec((1, tn), lambda i, j, k: (0, j)))

    # Double-buffered A/B/out tiles + f32 accumulator; keep the scoped VMEM
    # budget explicit so big tiles never trip the v7x (64 MiB) ceiling.
    vmem_bytes = (2 * (tm * tk + tk * tn) * in_dtype.itemsize
                  + 2 * tm * tn * out_dtype.itemsize
                  + tm * tn * 4 + 2 * tn * 4)
    vmem_limit = int(min(max(2 * vmem_bytes, 16 * 1024 * 1024),
                         64 * 1024 * 1024))

    call = pl.pallas_call(
        partial(_mm_kernel, relu=relu, nk=nk, has_bias=has_bias),
        out_shape=jax.ShapeDtypeStruct((Mp, Np), out_dtype),
        grid_spec=pltpu.PrefetchScalarGridSpec(
            num_scalar_prefetch=0,
            grid=(Mp // tm, Np // tn, nk),          # reduction axis last
            in_specs=in_specs,
            out_specs=pl.BlockSpec((tm, tn), lambda i, j, k: (i, j)),
            scratch_shapes=[pltpu.VMEM((tm, tn), jnp.float32)],
        ),
        compiler_params=pltpu.CompilerParams(
            dimension_semantics=("parallel", "parallel", "arbitrary"),
            vmem_limit_bytes=vmem_limit,
        ),
    )
    return jax.jit(call)


def pallas_matmul_padded(a, b, bias=None, relu=False, out_dtype=jnp.float32):
    """relu?(a @ b + bias) on already lane-padded operands (no repacking)."""
    M, K = a.shape
    K2, N = b.shape
    assert K == K2
    assert M % 8 == 0 and K % LANE == 0 and N % LANE == 0, (M, K, N)

    tm = _pick_tile(M, (256, 128, 64, 32, 16, 8))
    tk = _pick_tile(K, (1024, 512, 256, 128))
    tn = _pick_tile(N, (512, 256, 128))

    a_c = a.astype(COMPUTE_DTYPE)
    b_c = b.astype(COMPUTE_DTYPE)
    fn = _build_matmul(M, K, N, tm, tk, tn, bool(relu), bias is not None,
                       jnp.dtype(COMPUTE_DTYPE).name, jnp.dtype(out_dtype).name)
    if bias is not None:
        return fn(a_c, b_c, bias.reshape(1, N).astype(jnp.float32))
    return fn(a_c, b_c)


# ---------------------------------------------------------------------------
# GCN parameters (matching GraphConvolution.reset_parameters) and forward
# ---------------------------------------------------------------------------

def make_gcn_params(key, nfeat, nhid, output_dim):
    k1, k2, k3, k4 = jax.random.split(key, 4)
    stdv1 = 1.0 / math.sqrt(nhid)
    stdv2 = 1.0 / math.sqrt(output_dim)
    return {
        "w1": jax.random.uniform(k1, (nfeat, nhid), jnp.float32, -stdv1, stdv1),
        "b1": jax.random.uniform(k2, (nhid,), jnp.float32, -stdv1, stdv1),
        "w2": jax.random.uniform(k3, (nhid, output_dim), jnp.float32, -stdv2, stdv2),
        "b2": jax.random.uniform(k4, (output_dim,), jnp.float32, -stdv2, stdv2),
        "nfeat": nfeat, "nhid": nhid, "output_dim": output_dim,
    }


def _pad_params(params):
    nfeat, nhid, nout = params["nfeat"], params["nhid"], params["output_dim"]
    Fp = _round_up(nfeat, LANE)
    Hp = _round_up(nhid, LANE)
    Op = _round_up(nout, LANE)
    # Weights are cast to the MXU compute dtype ONCE here.
    w1p = _pad2d(params["w1"], Fp, Hp).astype(COMPUTE_DTYPE)
    w2p = _pad2d(params["w2"], Hp, Op).astype(COMPUTE_DTYPE)
    b1p = jnp.pad(params["b1"], (0, Hp - nhid))
    b2p = jnp.pad(params["b2"], (0, Op - nout))
    return w1p, b1p, w2p, b2p, (Fp, Hp, Op)


def gcn_forward(x, adj, params):
    """Matches GCN.forward: relu(gc1(x, adj)) -> gc2(., adj)."""
    N, F = x.shape
    assert adj.shape == (N, N)
    assert F == params["nfeat"]

    w1p, b1p, w2p, b2p, (Fp, Hp, Op) = _pad_params(params)
    Np = _round_up(N, LANE)

    # Pad activations/adjacency ONCE and carry padded (bf16) buffers through
    # all four matmuls; zero adj columns nullify padded-row garbage, so only a
    # single final slice is needed (no per-call zero-pad copies).
    x_p = _pad2d(x.astype(jnp.float32), Np, Fp).astype(COMPUTE_DTYPE)
    adj_p = _pad2d(adj.astype(jnp.float32), Np, Np).astype(COMPUTE_DTYPE)

    # layer 1: h1 = relu(adj @ (x @ W1) + b1)   (bias+relu fused in epilogue)
    s1 = pallas_matmul_padded(x_p, w1p, out_dtype=COMPUTE_DTYPE)
    h1 = pallas_matmul_padded(adj_p, s1, bias=b1p, relu=True,
                              out_dtype=COMPUTE_DTYPE)
    # layer 2: out = adj @ (h1 @ W2) + b2
    s2 = pallas_matmul_padded(h1, w2p, out_dtype=COMPUTE_DTYPE)
    out = pallas_matmul_padded(adj_p, s2, bias=b2p, relu=False,
                               out_dtype=jnp.float32)
    return out[:N, :params["output_dim"]]


if __name__ == "__main__":
    key = jax.random.PRNGKey(0)
    pkey, xkey, akey = jax.random.split(key, 3)

    num_nodes, nfeat, nhid, output_dim = 16, 32, 64, 32
    params = make_gcn_params(pkey, nfeat, nhid, output_dim)

    x = jax.random.normal(xkey, (num_nodes, nfeat), jnp.float32)
    # symmetric, self-looped, row-normalized adjacency (typical GCN input)
    a = (jax.random.uniform(akey, (num_nodes, num_nodes)) < 0.3).astype(jnp.float32)
    a = jnp.maximum(a, a.T) + jnp.eye(num_nodes, dtype=jnp.float32)
    adj = a / jnp.sum(a, axis=1, keepdims=True)

    fwd = jax.jit(lambda xx, aa: gcn_forward(xx, aa, params))
    out = jax.block_until_ready(fwd(x, adj))

    assert out.shape == (num_nodes, output_dim), out.shape
    assert bool(jnp.all(jnp.isfinite(out)))

    # Reference check (plain XLA, f32) -- bf16-compute tolerance.
    ref_h1 = jax.nn.relu(adj @ (x @ params["w1"]) + params["b1"])
    ref = adj @ (ref_h1 @ params["w2"]) + params["b2"]
    max_err = float(jnp.max(jnp.abs(out - ref)))
    assert max_err < 5e-2, max_err

    print("KERNEL_OK")
</pallas_src>

<mosaic_0001>
module attributes {stable_mosaic.version = 11 : i64} {
  func.func @_mm_kernel(%arg0: i32, %arg1: i32, %arg2: i32, %arg3: memref<128x128xbf16, #tpu.memory_space<vmem>>, %arg4: memref<128x128xbf16, #tpu.memory_space<vmem>>, %arg5: memref<128x128xbf16, #tpu.memory_space<vmem>>, %arg6: memref<128x128xf32, #tpu.memory_space<vmem>>) attributes {dimension_semantics = [#tpu.dimension_semantics<parallel>, #tpu.dimension_semantics<parallel>, #tpu.dimension_semantics<arbitrary>], iteration_bounds = array<i64: 1, 1, 1>, scalar_prefetch = 0 : i64, scratch_operands = 1 : i64, tpu.core_type = #tpu.core_type<tc>, window_params = [{transform_indices = @transform_0, window_bounds = array<i64: 128, 128>}, {transform_indices = @transform_1, window_bounds = array<i64: 128, 128>}, {transform_indices = @transform_2, window_bounds = array<i64: 128, 128>}]} {
    %c0_i32 = arith.constant 0 : i32
    %0 = arith.cmpi eq, %arg2, %c0_i32 : i32
    %1 = arith.extui %0 : i1 to i32
    %c0_i32_0 = arith.constant 0 : i32
    %2 = arith.cmpi ne, %1, %c0_i32_0 : i32
    scf.if %2 {
      %cst_10 = arith.constant 0.000000e+00 : f32
      %12 = vector.broadcast %cst_10 : f32 to vector<128x128xf32>
      %c0_11 = arith.constant 0 : index
      %c0_12 = arith.constant 0 : index
      %13 = vector.load %arg6[%c0_11, %c0_12] : memref<128x128xf32, #tpu.memory_space<vmem>>, vector<128x128xf32>
      tpu.vector_store %arg6[%c0_11, %c0_12], %12 {strides = array<i32>} : memref<128x128xf32, #tpu.memory_space<vmem>>, vector<128x128xf32>,
    } else {
    }
    %c0 = arith.constant 0 : index
    %c0_1 = arith.constant 0 : index
    %3 = vector.load %arg6[%c0, %c0_1] : memref<128x128xf32, #tpu.memory_space<vmem>>, vector<128x128xf32>
    %c0_2 = arith.constant 0 : index
    %c0_3 = arith.constant 0 : index
    %4 = vector.load %arg3[%c0_2, %c0_3] : memref<128x128xbf16, #tpu.memory_space<vmem>>, vector<128x128xbf16>
    %c0_4 = arith.constant 0 : index
    %c0_5 = arith.constant 0 : index
    %5 = vector.load %arg4[%c0_4, %c0_5] : memref<128x128xbf16, #tpu.memory_space<vmem>>, vector<128x128xbf16>
    %cst = arith.constant dense<0.000000e+00> : vector<128x128xf32>
    %6 = tpu.matmul %4, %5, %cst {dimension_numbers = #tpu.dot_dimension_numbers<[1], [0], [0], [1], [0, 0, 1, 1], [], []>} : vector<128x128xbf16>, vector<128x128xbf16>, vector<128x128xf32> -> vector<128x128xf32>
    %7 = arith.addf %3, %6 : vector<128x128xf32>
    %c0_6 = arith.constant 0 : index
    %c0_7 = arith.constant 0 : index
    %8 = vector.load %arg6[%c0_6, %c0_7] : memref<128x128xf32, #tpu.memory_space<vmem>>, vector<128x128xf32>
    tpu.vector_store %arg6[%c0_6, %c0_7], %7 {strides = array<i32>} : memref<128x128xf32, #tpu.memory_space<vmem>>, vector<128x128xf32>,
    %c0_i32_8 = arith.constant 0 : i32
    %9 = arith.cmpi eq, %arg2, %c0_i32_8 : i32
    %10 = arith.extui %9 : i1 to i32
    %c0_i32_9 = arith.constant 0 : i32
    %11 = arith.cmpi ne, %10, %c0_i32_9 : i32
    scf.if %11 {
      %c0_10 = arith.constant 0 : index
      %c0_11 = arith.constant 0 : index
      %12 = vector.load %arg6[%c0_10, %c0_11] : memref<128x128xf32, #tpu.memory_space<vmem>>, vector<128x128xf32>
      %13 = arith.truncf %12 : vector<128x128xf32> to vector<128x128xbf16>
      %c0_12 = arith.constant 0 : index
      %c0_13 = arith.constant 0 : index
      %14 = vector.load %arg5[%c0_12, %c0_13] : memref<128x128xbf16, #tpu.memory_space<vmem>>, vector<128x128xbf16>
      tpu.vector_store %arg5[%c0_12, %c0_13], %13 {strides = array<i32>} : memref<128x128xbf16, #tpu.memory_space<vmem>>, vector<128x128xbf16>,
    } else {
    }
    return
  }
  func.func @transform_0(%arg0: i32, %arg1: i32, %arg2: i32) -> (i32, i32) {
    %c0_i32 = arith.constant 0 : i32
    return %arg0, %arg2 : i32, i32
  }
  func.func @transform_1(%arg0: i32, %arg1: i32, %arg2: i32) -> (i32, i32) {
    %c0_i32 = arith.constant 0 : i32
    return %arg2, %arg1 : i32, i32
  }
  func.func @transform_2(%arg0: i32, %arg1: i32, %arg2: i32) -> (i32, i32) {
    %c0_i32 = arith.constant 0 : i32
    return %arg0, %arg1 : i32, i32
  }
}

</mosaic_0001>

<bundles_post_ra>
// kernel: tpu_custom_call.1
= control target key start
LH: loop header
LB: loop body
LE: loop exit
PB: predicated region body
PF: predicated region fallthrough
CT: control target
= control target key end

     0   :  { %7 = vsyncpa [#allocation4], 0  ;;  %s735_s0 = inlined_call_operand.hbm [shape: bf16[128,128], index: 0, kind: input, shape index: {}]   ;;  %s736_s1 = inlined_call_operand.hbm [shape: bf16[128,128], index: 1, kind: input, shape index: {}]   ;;  %s737_s2 = inlined_call_operand.hbm [shape: bf16[128,128], index: 2, kind: output, shape index: {}]  }
   0x1   :  { %8 = vsyncpa [#allocation7], 0 }
   0x2   :  { %9 = vsyncpa [#allocation5], 0  ;;  %s697_s9 = smov [#allocation3]  }
   0x3   :  { %s15_s10 = sshll.u32 %s697_s9, 4  ;;  %s16_s10 = int_to_ptr.vmem [resolvable:$true] %s15_s10 }
   0x4   :  { %s639_s11 = scalar_lea.vmem %s16_s10, 1024  ;;  %p644_p1 = scmp.lt.s32.totalorder %s16_s10, %s16_s10 }
   0x5   :  { %p640_p0 = scmp.ne.s32.totalorder %s16_s10, %s639_s11  ;;  %p645_p2 = scmp.lt.s32.totalorder %s639_s11, %s639_s11 }
   0x7   :  { %p646_p3 = por %p645_p2, %p644_p1 }
   0x9   :  { %p647_p4 = pnand %p646_p3, %p640_p0 }
   0xb   :  { %650 = shalt.err (!%p647_p4)
}
   0xc   :  { %s698_s12 = smov 64   ;;  %s699_s13 = smov 4  }
   0xd   :  { %21 = dma.hbm_to_vmem [thread:$0]  %s735_s0, 1024, %s16_s10, [#allocation4], %s698_s12, %s698_s12, %s699_s13  }
   0xe   :  { %s700_s16 = smov [#allocation6]  }
   0xf   :  { %s27_s17 = sshll.u32 %s700_s16, 4  ;;  %s28_s17 = int_to_ptr.vmem [resolvable:$true] %s27_s17 }
  0x10   :  { %s659_s18 = scalar_lea.vmem %s28_s17, 1024  ;;  %p664_p6 = scmp.lt.s32.totalorder %s28_s17, %s28_s17 }
  0x11   :  { %p660_p5 = scmp.ne.s32.totalorder %s28_s17, %s659_s18  ;;  %p665_p7 = scmp.lt.s32.totalorder %s659_s18, %s659_s18 }
  0x13   :  { %p666_p8 = por %p665_p7, %p664_p6 }
  0x15   :  { %p667_p9 = pnand %p666_p8, %p660_p5 }
  0x17   :  { %670 = shalt.err (!%p667_p9)
}
  0x18   :  { %33 = dma.hbm_to_vmem [thread:$0]  %s736_s1, 1024, %s28_s17, [#allocation7], %s698_s12, %s698_s12, %s699_s13  }
  0x19   :  { %691 = dma.done.wait [#allocation4], 1024  }
  0x1a   :  { %692 = vsyncadd [#allocation4], 4294966272 }
  0x1b   :  { %693 = dma.done.wait [#allocation7], 1024  }
  0x1c   :  { %694 = vsyncadd [#allocation7], 4294966272  ;;  %v615_v0 = vld [vmem:[#allocation6 + $0x38] sm:$0xff]   ;;  %v616_v1 = vld [vmem:[#allocation6 + $0x30] sm:$0xff]   ;;  %s701_s0 = smov [#allocation8]  }
  0x1d   :  { %562 = vmatprep.subr.bf16.mxu0 %v615_v0  ;;  %594 = vmatprep.subr.bf16.mxu1 %v615_v0  ;;  %v617_v2 = vld [vmem:[#allocation6 + $0x28] sm:$0xff]   ;;  %v618_v3 = vld [vmem:[#allocation6 + $0x20] sm:$0xff]   ;;  %v619_v6 = vld [vmem:[#allocation6 + $0x18] sm:$0xff]   ;;  %s438_s1 = sshll.u32 %s701_s0, 4  ;;  %s439_s1 = int_to_ptr.vmem [resolvable:$true] %s438_s1 }
  0x1e   :  { %563 = vmatpush3.bf16.msra.mxu0 %v615_v0  ;;  %602 = vmatpush3.bf16.msra.mxu1 %v615_v0  ;;  %v623_v4 = vld [vmem:[#allocation3] sm:$0xff]   ;;  %v620_v7 = vld [vmem:[#allocation6 + $0x10] sm:$0xff]   ;;  %v621_v8 = vld [vmem:[#allocation6 + $0x8] sm:$0xff]   ;;  %s671_s21 = scalar_lea.vmem %s439_s1, 1024  ;;  %p676_p11 = scmp.lt.s32.totalorder %s439_s1, %s439_s1 }
  0x1f   :  { %564 = vmatprep.subr.bf16.mxu0 %v616_v1  ;;  %595 = vmatprep.subr.bf16.mxu1 %v616_v1  ;;  %v624_v5 = vld [vmem:[#allocation3 + $0x20] sm:$0xff]   ;;  %v625_v10 = vld [vmem:[#allocation3 + $0x8] sm:$0xff]   ;;  %v627_v12 = vld [vmem:[#allocation3 + $0x10] sm:$0xff]   ;;  %p672_p10 = scmp.ne.s32.totalorder %s439_s1, %s671_s21  ;;  %p677_p12 = scmp.lt.s32.totalorder %s671_s21, %s671_s21 }
  0x20   :  { %578 = vmatprep.mubr.bf16.mxu0 %v623_v4  ;;  %586 = vmatprep.mubr.bf16.mxu1 %v624_v5  ;;  %v622_v9 = vld [vmem:[#allocation6] sm:$0xff]   ;;  %v626_v11 = vld [vmem:[#allocation3 + $0x28] sm:$0xff]   ;;  %v628_v13 = vld [vmem:[#allocation3 + $0x30] sm:$0xff]  }
  0x21   :  { %v629_v14 = vld [vmem:[#allocation3 + $0x18] sm:$0xff]   ;;  %p678_p13 = por %p677_p12, %p676_p11 }
  0x22   :  { %565 = vmatpush3.bf16.msra.mxu0 %v616_v1  ;;  %603 = vmatpush3.bf16.msra.mxu1 %v616_v1  ;;  %v630_v15 = vld [vmem:[#allocation3 + $0x38] sm:$0xff]  }
  0x23   :  { %566 = vmatprep.subr.bf16.mxu0 %v617_v2  ;;  %596 = vmatprep.subr.bf16.mxu1 %v617_v2  ;;  %p679_p0 = pnand %p678_p13, %p672_p10 }
  0x26   :  { %567 = vmatpush3.bf16.msra.mxu0 %v617_v2  ;;  %604 = vmatpush3.bf16.msra.mxu1 %v617_v2 }
  0x27   :  { %568 = vmatprep.subr.bf16.mxu0 %v618_v3  ;;  %597 = vmatprep.subr.bf16.mxu1 %v618_v3 }
  0x2a   :  { %569 = vmatpush3.bf16.msra.mxu0 %v618_v3  ;;  %605 = vmatpush3.bf16.msra.mxu1 %v618_v3 }
  0x2b   :  { %570 = vmatprep.subr.bf16.mxu0 %v619_v6  ;;  %598 = vmatprep.subr.bf16.mxu1 %v619_v6 }
  0x2e   :  { %571 = vmatpush3.bf16.msra.mxu0 %v619_v6  ;;  %606 = vmatpush3.bf16.msra.mxu1 %v619_v6 }
  0x2f   :  { %572 = vmatprep.subr.bf16.mxu0 %v620_v7  ;;  %599 = vmatprep.subr.bf16.mxu1 %v620_v7 }
  0x32   :  { %573 = vmatpush3.bf16.msra.mxu0 %v620_v7  ;;  %607 = vmatpush3.bf16.msra.mxu1 %v620_v7 }
  0x33   :  { %574 = vmatprep.subr.bf16.mxu0 %v621_v8  ;;  %600 = vmatprep.subr.bf16.mxu1 %v621_v8 }
  0x36   :  { %575 = vmatpush3.bf16.msra.mxu0 %v621_v8  ;;  %608 = vmatpush3.bf16.msra.mxu1 %v621_v8 }
  0x37   :  { %576 = vmatprep.subr.bf16.mxu0 %v622_v9  ;;  %601 = vmatprep.subr.bf16.mxu1 %v622_v9 }
  0x3a   :  { %577 = vmatpush3.bf16.msra.mxu0 %v622_v9  ;;  %609 = vmatpush3.bf16.msra.mxu1 %v622_v9 }
  0x3d   :  { %579 = vmatmul.mubr.bf16.vlgmr.msra.gmra.mxu0 %v625_v10  ;;  %587 = vmatmul.mubr.bf16.vlgmr.msra.gmra.mxu1 %v626_v11 }
  0x3e   :  { %582 = vmatprep.mubr.bf16.mxu0 %v627_v12  ;;  %590 = vmatprep.mubr.bf16.mxu1 %v628_v13 }
  0x45   :  { %583 = vmatmul.mubr.bf16.gmra.mxu0 %v629_v14  ;;  %591 = vmatmul.mubr.bf16.gmra.mxu1 %v630_v15 }
  0xfd   :  { %v580_v16 = vpop.f32.mrf.mxu0  ;;  %v588_v17 = vpop.f32.mrf.mxu1 }
  0xff   :  { %v239_v18 = vpop.f32.mrf.mxu0  ;;  %v271_v19 = vpop.f32.mrf.mxu1 }
 0x101   :  { %v581_v20 = vpop.f32.mrf.mxu0  ;;  %v589_v21 = vpop.f32.mrf.mxu1 }
 0x102   :  { %v507_v22 = vpack.c.bf16 %v581_v20, %v580_v16  ;;  %v527_v23 = vpack.c.bf16 %v589_v21, %v588_v17 }
 0x103   :  { %v242_v24 = vpop.f32.mrf.mxu0  ;;  %v274_v25 = vpop.f32.mrf.mxu1 }
 0x104   :  { %539 = vst [vmem:[#allocation8 + $0x8] sm:$0xff] %v507_v22   ;;  %543 = vst [vmem:[#allocation8 + $0x28] sm:$0xff] %v527_v23   ;;  %v502_v26 = vpack.c.bf16 %v242_v24, %v239_v18  ;;  %v522_v27 = vpack.c.bf16 %v274_v25, %v271_v19 }
 0x105   :  { %v584_v28 = vpop.f32.mrf.mxu0  ;;  %v592_v29 = vpop.f32.mrf.mxu1 }
 0x106   :  { %503 = vst [vmem:[#allocation8] sm:$0xff] %v502_v26   ;;  %542 = vst [vmem:[#allocation8 + $0x20] sm:$0xff] %v522_v27  }
 0x107   :  { %v255_v30 = vpop.f32.mrf.mxu0  ;;  %v287_v31 = vpop.f32.mrf.mxu1 }
 0x109   :  { %v585_v32 = vpop.f32.mrf.mxu0  ;;  %v593_v33 = vpop.f32.mrf.mxu1 }
 0x10a   :  { %v517_v34 = vpack.c.bf16 %v585_v32, %v584_v28  ;;  %v537_v35 = vpack.c.bf16 %v593_v33, %v592_v29 }
 0x10b   :  { %v258_v36 = vpop.f32.mrf.mxu0  ;;  %v290_v37 = vpop.f32.mrf.mxu1 }
 0x10c   :  { %541 = vst [vmem:[#allocation8 + $0x18] sm:$0xff] %v517_v34   ;;  %545 = vst [vmem:[#allocation8 + $0x38] sm:$0xff] %v537_v35   ;;  %v512_v38 = vpack.c.bf16 %v258_v36, %v255_v30  ;;  %v532_v39 = vpack.c.bf16 %v290_v37, %v287_v31 }
 0x10e   :  { %540 = vst [vmem:[#allocation8 + $0x10] sm:$0xff] %v512_v38   ;;  %544 = vst [vmem:[#allocation8 + $0x30] sm:$0xff] %v532_v39  }
 0x10f   :  { %682 = shalt.err (!%p679_p0)
}
 0x110   :  { %444 = dma.vmem_to_hbm [thread:$0]  %s439_s1, 1024, %s737_s2, [#allocation5], %s698_s12, %s698_s12, %s699_s13  }
 0x111   :  { %695 = dma.done.wait [#allocation5], 1024  }
 0x112   :  { %696 = vsyncadd [#allocation5], 4294966272 }
 0x113   :  { %448 = vsyncpa [#allocation4], 1 }
 0x114   :  { %449 = vsyncpa [#allocation7], 1 }
 0x115   :  { %450 = vsyncpa [#allocation5], 1 }

</bundles_post_ra>
